<compile_context>
chip_gen: v7x
topology: tpu7x:2x2x1
jax: 0.10.0
libtpu: 0.0.40
codegen_flags: <defaults>
</compile_context>

<pallas_src>
import jax
import jax.numpy as jnp
from jax import lax
from jax.experimental import pallas as pl
from jax.experimental.pallas import tpu as pltpu

_VMEM_BLOCK_BUDGET = 12 * 1024 * 1024     # target per-block VMEM footprint (estimate)
_VMEM_LIMIT = 48 * 1024 * 1024            # scoped VMEM limit handed to Mosaic


def _largest_divisor(n, fits):
    for d in range(n, 0, -1):
        if n % d == 0 and fits(d):
            return d
    return 1


# --------------------------------------------------------------------------
# 3x3 conv (stride 1, zero pad 1) + bias + ReLU
# taps unrolled in-kernel over a flattened, width-padded spatial representation
# --------------------------------------------------------------------------
def _make_conv_kernel(offsets):
    """offsets: per-tap start offset (in flattened spatial rows) into the input block."""
    def kernel(x_ref, w_ref, b_ref, o_ref):
        lout, cout = o_ref.shape[2], o_ref.shape[3]
        acc = jnp.zeros((lout, cout), jnp.float32)
        for i, off in enumerate(offsets):
            xs = x_ref[0, 0, pl.ds(off, lout), :]          # (lout, K) shifted tap view
            acc = acc + jnp.dot(xs, w_ref[i], preferred_element_type=jnp.float32)
        acc = acc + b_ref[...]                             # f32 bias
        o_ref[0, 0] = jnp.maximum(acc, 0.0).astype(o_ref.dtype)
    return kernel


def _conv_call(x_tiles, w_taps, b_row, offsets, lout, out_dtype):
    n, n_tiles, lin, k = x_tiles.shape
    t, _, cout = w_taps.shape
    return pl.pallas_call(
        _make_conv_kernel(tuple(offsets)),
        out_shape=jax.ShapeDtypeStruct((n, n_tiles, lout, cout), out_dtype),
        grid=(n, n_tiles),
        in_specs=[
            pl.BlockSpec((1, 1, lin, k), lambda i, j: (i, j, 0, 0)),
            pl.BlockSpec((t, k, cout), lambda i, j: (0, 0, 0)),   # weights stay resident
            pl.BlockSpec((1, cout), lambda i, j: (0, 0)),
        ],
        out_specs=pl.BlockSpec((1, 1, lout, cout), lambda i, j: (i, j, 0, 0)),
        compiler_params=pltpu.CompilerParams(
            dimension_semantics=("parallel", "parallel"),
            vmem_limit_bytes=_VMEM_LIMIT),
    )(x_tiles, w_taps, b_row)


def conv3x3_relu(x_nhwc, w, b, *, compute_dtype=jnp.bfloat16,
                 budget=_VMEM_BLOCK_BUDGET):
    """3x3 conv (stride 1, zero pad 1) + bias + ReLU on an NHWC tensor."""
    n, h, wdt, cin = x_nhwc.shape
    cout = w.shape[-1]
    esz = jnp.dtype(compute_dtype).itemsize
    x = x_nhwc.astype(compute_dtype)
    wq = w.astype(compute_dtype)
    b_row = b.reshape(1, cout).astype(jnp.float32)

    if cin <= 8:
        # Fold all 9 taps into the contraction dim: one (HW, 9*Cin)@(9*Cin, Cout) matmul.
        xp = jnp.pad(x, ((0, 0), (1, 1), (1, 1), (0, 0)))
        xc = jnp.concatenate(
            [xp[:, ky:ky + h, kx:kx + wdt, :] for ky in range(3) for kx in range(3)],
            axis=-1)                                         # (N, H, W, 9*Cin)
        k = 9 * cin

        def fits(th):
            lo = th * wdt
            return (2 * lo * k * esz + 2 * lo * cout * esz + lo * cout * 4
                    + lo * k * esz + 2 * k * cout * esz) <= budget

        th = _largest_divisor(h, fits)
        n_tiles = h // th
        lout = th * wdt
        x_tiles = xc.reshape(n, n_tiles, lout, k)
        w_taps = wq.reshape(1, k, cout)
        out = _conv_call(x_tiles, w_taps, b_row, (0,), lout, compute_dtype)
        return out.reshape(n, h, wdt, cout)

    # General path: flattened padded-width representation + 9 in-kernel tap slices.
    wp = wdt + 2
    halo = 2 * wp + 2
    xp = jnp.pad(x, ((0, 0), (1, 1), (1, 1), (0, 0)))        # (N, H+2, Wp, Cin)
    xf = xp.reshape(n, (h + 2) * wp, cin)
    xf = jnp.pad(xf, ((0, 0), (1, 1), (0, 0)))               # +-1 element guard

    def fits(th):
        lo = th * wp
        return (2 * (lo + halo) * cin * esz + 2 * lo * cout * esz + lo * cout * 4
                + lo * cin * esz + 2 * 9 * cin * cout * esz) <= budget

    th = _largest_divisor(h, fits)
    n_tiles = h // th
    s = th * wp                                              # flattened output rows/tile
    lin = s + halo
    # Row tiles with a tiny duplicated halo (2*Wp+2 rows) so plain Blocked BlockSpecs
    # can be used while all 9 taps read from a single resident VMEM block.
    x_tiles = jnp.stack([xf[:, t * s:t * s + lin, :] for t in range(n_tiles)], axis=1)
    w_taps = wq.reshape(9, cin, cout)
    offsets = tuple(ky * wp + kx for ky in range(3) for kx in range(3))
    out = _conv_call(x_tiles, w_taps, b_row, offsets, s, compute_dtype)
    # Drop the two padded-width garbage columns.
    return out.reshape(n, h, wp, cout)[:, :, 1:wdt + 1, :]


# --------------------------------------------------------------------------
# 2x2 max-pool, stride 2 (no HBM relayout: works on a free NHWC reshape)
# --------------------------------------------------------------------------
def _pool_kernel(x_ref, o_ref):
    c = o_ref.shape[-1]
    a = x_ref[0, :, 0]                         # (THo, Wo, 2C) - even rows
    b = x_ref[0, :, 1]                         # (THo, Wo, 2C) - odd rows
    r = jnp.maximum(a, b)                      # max over the 2 rows of each window
    o_ref[0] = jnp.maximum(r[..., :c], r[..., c:])   # max over the 2 columns


def maxpool2x2(x_nhwc, *, budget=_VMEM_BLOCK_BUDGET):
    n, h, w, c = x_nhwc.shape
    ho, wo = h // 2, w // 2
    # TODO(synk): odd H/W would need PyTorch floor-mode edge handling; VGG never hits it.
    esz = jnp.dtype(x_nhwc.dtype).itemsize
    xr = x_nhwc.reshape(n, ho, 2, wo, 2 * c)   # free, layout-preserving reshape

    def fits(tho):
        in_b = tho * 2 * wo * 2 * c * esz
        out_b = tho * wo * c * esz
        return 3 * in_b + 2 * out_b <= budget

    tho = _largest_divisor(ho, fits)
    n_tiles = ho // tho
    return pl.pallas_call(
        _pool_kernel,
        out_shape=jax.ShapeDtypeStruct((n, ho, wo, c), x_nhwc.dtype),
        grid=(n, n_tiles),
        in_specs=[pl.BlockSpec((1, tho, 2, wo, 2 * c),
                               lambda i, j: (i, j, 0, 0, 0))],
        out_specs=pl.BlockSpec((1, tho, wo, c), lambda i, j: (i, j, 0, 0)),
        compiler_params=pltpu.CompilerParams(
            dimension_semantics=("parallel", "parallel"),
            vmem_limit_bytes=_VMEM_LIMIT),
    )(xr)


# --------------------------------------------------------------------------
# VGG19 feature-slice model
# --------------------------------------------------------------------------
_VGG19_CFG = [
    [(3, 64), (64, 64)],                                        # slice1
    ['M', (64, 128), (128, 128)],                               # slice2
    ['M', (128, 256), (256, 256)],                              # slice3
    [(256, 256), (256, 256), 'M', (256, 512), (512, 512)],      # slice4
    [(512, 512), (512, 512), 'M', (512, 512), (512, 512)],      # slice5
]


def init_vgg19_params(key):
    # TODO(synk): the PyTorch module loads pretrained weights from 'vgg19-dcbb9e9d.pth';
    # here weights are synthetic (deterministic He init) since no file access is allowed.
    params = []
    for slice_cfg in _VGG19_CFG:
        slice_params = []
        for op in slice_cfg:
            if op == 'M':
                slice_params.append(None)
            else:
                cin, cout = op
                key, wk, bk = jax.random.split(key, 3)
                std = (2.0 / (9.0 * cin)) ** 0.5
                w = std * jax.random.normal(wk, (3, 3, cin, cout), jnp.float32)
                b = 0.01 * jax.random.normal(bk, (cout,), jnp.float32)
                slice_params.append((w, b))
        params.append(slice_params)
    return params


def vgg19_forward(params, x_nchw, compute_dtype=jnp.bfloat16):
    """Returns [h_relu1, ..., h_relu5], each NCHW float32 (PyTorch semantics)."""
    x = jnp.transpose(x_nchw, (0, 2, 3, 1)).astype(compute_dtype)   # NCHW -> NHWC
    outs = []
    for slice_cfg, slice_params in zip(_VGG19_CFG, params):
        for op, p in zip(slice_cfg, slice_params):
            if op == 'M':
                x = maxpool2x2(x)
            else:
                w, b = p
                x = conv3x3_relu(x, w, b, compute_dtype=compute_dtype)
        outs.append(jnp.transpose(x, (0, 3, 1, 2)).astype(jnp.float32))  # NHWC -> NCHW
    return outs


if __name__ == "__main__":
    key = jax.random.PRNGKey(0)
    pkey, xkey, k1, k2, k3 = jax.random.split(key, 5)

    # ---- correctness spot checks (f32 compute) against XLA references --------
    xa = jax.random.normal(k1, (2, 8, 8, 32), jnp.float32)
    wa = 0.1 * jax.random.normal(k2, (3, 3, 32, 48), jnp.float32)
    ba = 0.1 * jax.random.normal(k3, (48,), jnp.float32)

    got = conv3x3_relu(xa, wa, ba, compute_dtype=jnp.float32)
    ref = jnp.maximum(
        lax.conv_general_dilated(xa, wa, (1, 1), "SAME",
                                 dimension_numbers=("NHWC", "HWIO", "NHWC"),
                                 precision=lax.Precision.HIGHEST) + ba, 0.0)
    assert jnp.allclose(got, ref, rtol=5e-2, atol=5e-2), \
        float(jnp.max(jnp.abs(got - ref)))

    xa3, wa3, ba3 = xa[..., :3], wa[:, :, :3, :16], ba[:16]
    got3 = conv3x3_relu(xa3, wa3, ba3, compute_dtype=jnp.float32)
    ref3 = jnp.maximum(
        lax.conv_general_dilated(xa3, wa3, (1, 1), "SAME",
                                 dimension_numbers=("NHWC", "HWIO", "NHWC"),
                                 precision=lax.Precision.HIGHEST) + ba3, 0.0)
    assert jnp.allclose(got3, ref3, rtol=5e-2, atol=5e-2)

    gotp = maxpool2x2(xa)
    refp = lax.reduce_window(xa, -jnp.inf, lax.max,
                             (1, 2, 2, 1), (1, 2, 2, 1), "VALID")
    assert jnp.allclose(gotp, refp)

    # ---- full VGG19 feature extractor (bf16 matmuls, f32 accumulation) -------
    params = init_vgg19_params(pkey)
    x = jax.random.normal(xkey, (2, 3, 32, 32), jnp.float32)   # NCHW, PyTorch-style
    fwd = jax.jit(vgg19_forward)
    outs = jax.block_until_ready(fwd(params, x))

    expected = [(2, 64, 32, 32), (2, 128, 16, 16), (2, 256, 8, 8),
                (2, 512, 4, 4), (2, 512, 2, 2)]
    got_shapes = [tuple(o.shape) for o in outs]
    assert got_shapes == expected, (got_shapes, expected)
    assert all(o.dtype == jnp.float32 for o in outs)
    assert all(bool(jnp.all(jnp.isfinite(o))) for o in outs)

    print("KERNEL_OK")
</pallas_src>

<mosaic_0001>
module attributes {stable_mosaic.version = 11 : i64} {
  func.func @kernel(%arg0: i32, %arg1: i32, %arg2: memref<1x1x102x32xf32, #tpu.memory_space<vmem>>, %arg3: memref<9x32x48xf32, #tpu.memory_space<vmem>>, %arg4: memref<1x48xf32, #tpu.memory_space<vmem>>, %arg5: memref<1x1x80x48xf32, #tpu.memory_space<vmem>>) attributes {dimension_semantics = [#tpu.dimension_semantics<parallel>, #tpu.dimension_semantics<parallel>], iteration_bounds = array<i64: 2, 1>, scalar_prefetch = 0 : i64, scratch_operands = 0 : i64, tpu.core_type = #tpu.core_type<tc>, window_params = [{transform_indices = @transform_0, window_bounds = array<i64: 1, 1, 102, 32>}, {pipeline_mode = #tpu.pipeline_mode<synchronous>, transform_indices = @transform_1, window_bounds = array<i64: 9, 32, 48>}, {pipeline_mode = #tpu.pipeline_mode<synchronous>, transform_indices = @transform_2, window_bounds = array<i64: 1, 48>}, {transform_indices = @transform_3, window_bounds = array<i64: 1, 1, 80, 48>}]} {
    %cst = arith.constant 0.000000e+00 : f32
    %0 = vector.broadcast %cst : f32 to vector<80x48xf32>
    %c0 = arith.constant 0 : index
    %c0_0 = arith.constant 0 : index
    %c0_1 = arith.constant 0 : index
    %c0_2 = arith.constant 0 : index
    %1 = vector.load %arg2[%c0, %c0_0, %c0_1, %c0_2] : memref<1x1x102x32xf32, #tpu.memory_space<vmem>>, vector<1x1x80x32xf32>
    %2 = vector.shape_cast %1 : vector<1x1x80x32xf32> to vector<80x32xf32>
    %c0_3 = arith.constant 0 : index
    %c0_4 = arith.constant 0 : index
    %c0_5 = arith.constant 0 : index
    %3 = vector.load %arg3[%c0_3, %c0_4, %c0_5] : memref<9x32x48xf32, #tpu.memory_space<vmem>>, vector<1x32x48xf32>
    %4 = vector.shape_cast %3 : vector<1x32x48xf32> to vector<32x48xf32>
    %cst_6 = arith.constant dense<0.000000e+00> : vector<80x48xf32>
    %5 = tpu.matmul %2, %4, %cst_6 {dimension_numbers = #tpu.dot_dimension_numbers<[1], [0], [0], [1], [0, 0, 1, 1], [], []>} : vector<80x32xf32>, vector<32x48xf32>, vector<80x48xf32> -> vector<80x48xf32>
    %6 = arith.addf %0, %5 : vector<80x48xf32>
    %c0_7 = arith.constant 0 : index
    %c0_8 = arith.constant 0 : index
    %c1 = arith.constant 1 : index
    %c0_9 = arith.constant 0 : index
    %7 = vector.load %arg2[%c0_7, %c0_8, %c1, %c0_9] : memref<1x1x102x32xf32, #tpu.memory_space<vmem>>, vector<1x1x80x32xf32>
    %8 = vector.shape_cast %7 : vector<1x1x80x32xf32> to vector<80x32xf32>
    %c1_10 = arith.constant 1 : index
    %c0_11 = arith.constant 0 : index
    %c0_12 = arith.constant 0 : index
    %9 = vector.load %arg3[%c1_10, %c0_11, %c0_12] : memref<9x32x48xf32, #tpu.memory_space<vmem>>, vector<1x32x48xf32>
    %10 = vector.shape_cast %9 : vector<1x32x48xf32> to vector<32x48xf32>
    %cst_13 = arith.constant dense<0.000000e+00> : vector<80x48xf32>
    %11 = tpu.matmul %8, %10, %cst_13 {dimension_numbers = #tpu.dot_dimension_numbers<[1], [0], [0], [1], [0, 0, 1, 1], [], []>} : vector<80x32xf32>, vector<32x48xf32>, vector<80x48xf32> -> vector<80x48xf32>
    %12 = arith.addf %6, %11 : vector<80x48xf32>
    %c0_14 = arith.constant 0 : index
    %c0_15 = arith.constant 0 : index
    %c2 = arith.constant 2 : index
    %c0_16 = arith.constant 0 : index
    %13 = vector.load %arg2[%c0_14, %c0_15, %c2, %c0_16] : memref<1x1x102x32xf32, #tpu.memory_space<vmem>>, vector<1x1x80x32xf32>
    %14 = vector.shape_cast %13 : vector<1x1x80x32xf32> to vector<80x32xf32>
    %c2_17 = arith.constant 2 : index
    %c0_18 = arith.constant 0 : index
    %c0_19 = arith.constant 0 : index
    %15 = vector.load %arg3[%c2_17, %c0_18, %c0_19] : memref<9x32x48xf32, #tpu.memory_space<vmem>>, vector<1x32x48xf32>
    %16 = vector.shape_cast %15 : vector<1x32x48xf32> to vector<32x48xf32>
    %cst_20 = arith.constant dense<0.000000e+00> : vector<80x48xf32>
    %17 = tpu.matmul %14, %16, %cst_20 {dimension_numbers = #tpu.dot_dimension_numbers<[1], [0], [0], [1], [0, 0, 1, 1], [], []>} : vector<80x32xf32>, vector<32x48xf32>, vector<80x48xf32> -> vector<80x48xf32>
    %18 = arith.addf %12, %17 : vector<80x48xf32>
    %c0_21 = arith.constant 0 : index
    %c0_22 = arith.constant 0 : index
    %c10 = arith.constant 10 : index
    %c0_23 = arith.constant 0 : index
    %19 = vector.load %arg2[%c0_21, %c0_22, %c10, %c0_23] : memref<1x1x102x32xf32, #tpu.memory_space<vmem>>, vector<1x1x80x32xf32>
    %20 = vector.shape_cast %19 : vector<1x1x80x32xf32> to vector<80x32xf32>
    %c3 = arith.constant 3 : index
    %c0_24 = arith.constant 0 : index
    %c0_25 = arith.constant 0 : index
    %21 = vector.load %arg3[%c3, %c0_24, %c0_25] : memref<9x32x48xf32, #tpu.memory_space<vmem>>, vector<1x32x48xf32>
    %22 = vector.shape_cast %21 : vector<1x32x48xf32> to vector<32x48xf32>
    %cst_26 = arith.constant dense<0.000000e+00> : vector<80x48xf32>
    %23 = tpu.matmul %20, %22, %cst_26 {dimension_numbers = #tpu.dot_dimension_numbers<[1], [0], [0], [1], [0, 0, 1, 1], [], []>} : vector<80x32xf32>, vector<32x48xf32>, vector<80x48xf32> -> vector<80x48xf32>
    %24 = arith.addf %18, %23 : vector<80x48xf32>
    %c0_27 = arith.constant 0 : index
    %c0_28 = arith.constant 0 : index
    %c11 = arith.constant 11 : index
    %c0_29 = arith.constant 0 : index
    %25 = vector.load %arg2[%c0_27, %c0_28, %c11, %c0_29] : memref<1x1x102x32xf32, #tpu.memory_space<vmem>>, vector<1x1x80x32xf32>
    %26 = vector.shape_cast %25 : vector<1x1x80x32xf32> to vector<80x32xf32>
    %c4 = arith.constant 4 : index
    %c0_30 = arith.constant 0 : index
    %c0_31 = arith.constant 0 : index
    %27 = vector.load %arg3[%c4, %c0_30, %c0_31] : memref<9x32x48xf32, #tpu.memory_space<vmem>>, vector<1x32x48xf32>
    %28 = vector.shape_cast %27 : vector<1x32x48xf32> to vector<32x48xf32>
    %cst_32 = arith.constant dense<0.000000e+00> : vector<80x48xf32>
    %29 = tpu.matmul %26, %28, %cst_32 {dimension_numbers = #tpu.dot_dimension_numbers<[1], [0], [0], [1], [0, 0, 1, 1], [], []>} : vector<80x32xf32>, vector<32x48xf32>, vector<80x48xf32> -> vector<80x48xf32>
    %30 = arith.addf %24, %29 : vector<80x48xf32>
    %c0_33 = arith.constant 0 : index
    %c0_34 = arith.constant 0 : index
    %c12 = arith.constant 12 : index
    %c0_35 = arith.constant 0 : index
    %31 = vector.load %arg2[%c0_33, %c0_34, %c12, %c0_35] : memref<1x1x102x32xf32, #tpu.memory_space<vmem>>, vector<1x1x80x32xf32>
    %32 = vector.shape_cast %31 : vector<1x1x80x32xf32> to vector<80x32xf32>
    %c5 = arith.constant 5 : index
    %c0_36 = arith.constant 0 : index
    %c0_37 = arith.constant 0 : index
    %33 = vector.load %arg3[%c5, %c0_36, %c0_37] : memref<9x32x48xf32, #tpu.memory_space<vmem>>, vector<1x32x48xf32>
    %34 = vector.shape_cast %33 : vector<1x32x48xf32> to vector<32x48xf32>
    %cst_38 = arith.constant dense<0.000000e+00> : vector<80x48xf32>
    %35 = tpu.matmul %32, %34, %cst_38 {dimension_numbers = #tpu.dot_dimension_numbers<[1], [0], [0], [1], [0, 0, 1, 1], [], []>} : vector<80x32xf32>, vector<32x48xf32>, vector<80x48xf32> -> vector<80x48xf32>
    %36 = arith.addf %30, %35 : vector<80x48xf32>
    %c0_39 = arith.constant 0 : index
    %c0_40 = arith.constant 0 : index
    %c20 = arith.constant 20 : index
    %c0_41 = arith.constant 0 : index
    %37 = vector.load %arg2[%c0_39, %c0_40, %c20, %c0_41] : memref<1x1x102x32xf32, #tpu.memory_space<vmem>>, vector<1x1x80x32xf32>
    %38 = vector.shape_cast %37 : vector<1x1x80x32xf32> to vector<80x32xf32>
    %c6 = arith.constant 6 : index
    %c0_42 = arith.constant 0 : index
    %c0_43 = arith.constant 0 : index
    %39 = vector.load %arg3[%c6, %c0_42, %c0_43] : memref<9x32x48xf32, #tpu.memory_space<vmem>>, vector<1x32x48xf32>
    %40 = vector.shape_cast %39 : vector<1x32x48xf32> to vector<32x48xf32>
    %cst_44 = arith.constant dense<0.000000e+00> : vector<80x48xf32>
    %41 = tpu.matmul %38, %40, %cst_44 {dimension_numbers = #tpu.dot_dimension_numbers<[1], [0], [0], [1], [0, 0, 1, 1], [], []>} : vector<80x32xf32>, vector<32x48xf32>, vector<80x48xf32> -> vector<80x48xf32>
    %42 = arith.addf %36, %41 : vector<80x48xf32>
    %c0_45 = arith.constant 0 : index
    %c0_46 = arith.constant 0 : index
    %c21 = arith.constant 21 : index
    %c0_47 = arith.constant 0 : index
    %43 = vector.load %arg2[%c0_45, %c0_46, %c21, %c0_47] : memref<1x1x102x32xf32, #tpu.memory_space<vmem>>, vector<1x1x80x32xf32>
    %44 = vector.shape_cast %43 : vector<1x1x80x32xf32> to vector<80x32xf32>
    %c7 = arith.constant 7 : index
    %c0_48 = arith.constant 0 : index
    %c0_49 = arith.constant 0 : index
    %45 = vector.load %arg3[%c7, %c0_48, %c0_49] : memref<9x32x48xf32, #tpu.memory_space<vmem>>, vector<1x32x48xf32>
    %46 = vector.shape_cast %45 : vector<1x32x48xf32> to vector<32x48xf32>
    %cst_50 = arith.constant dense<0.000000e+00> : vector<80x48xf32>
    %47 = tpu.matmul %44, %46, %cst_50 {dimension_numbers = #tpu.dot_dimension_numbers<[1], [0], [0], [1], [0, 0, 1, 1], [], []>} : vector<80x32xf32>, vector<32x48xf32>, vector<80x48xf32> -> vector<80x48xf32>
    %48 = arith.addf %42, %47 : vector<80x48xf32>
    %c0_51 = arith.constant 0 : index
    %c0_52 = arith.constant 0 : index
    %c22 = arith.constant 22 : index
    %c0_53 = arith.constant 0 : index
    %49 = vector.load %arg2[%c0_51, %c0_52, %c22, %c0_53] : memref<1x1x102x32xf32, #tpu.memory_space<vmem>>, vector<1x1x80x32xf32>
    %50 = vector.shape_cast %49 : vector<1x1x80x32xf32> to vector<80x32xf32>
    %c8 = arith.constant 8 : index
    %c0_54 = arith.constant 0 : index
    %c0_55 = arith.constant 0 : index
    %51 = vector.load %arg3[%c8, %c0_54, %c0_55] : memref<9x32x48xf32, #tpu.memory_space<vmem>>, vector<1x32x48xf32>
    %52 = vector.shape_cast %51 : vector<1x32x48xf32> to vector<32x48xf32>
    %cst_56 = arith.constant dense<0.000000e+00> : vector<80x48xf32>
    %53 = tpu.matmul %50, %52, %cst_56 {dimension_numbers = #tpu.dot_dimension_numbers<[1], [0], [0], [1], [0, 0, 1, 1], [], []>} : vector<80x32xf32>, vector<32x48xf32>, vector<80x48xf32> -> vector<80x48xf32>
    %54 = arith.addf %48, %53 : vector<80x48xf32>
    %c0_57 = arith.constant 0 : index
    %c0_58 = arith.constant 0 : index
    %55 = vector.load %arg4[%c0_57, %c0_58] : memref<1x48xf32, #tpu.memory_space<vmem>>, vector<1x48xf32>
    %56 = vector.broadcast %55 : vector<1x48xf32> to vector<80x48xf32>
    %57 = arith.addf %54, %56 : vector<80x48xf32>
    %cst_59 = arith.constant 0.000000e+00 : f32
    %58 = vector.broadcast %cst_59 : f32 to vector<80x48xf32>
    %59 = arith.maximumf %57, %58 : vector<80x48xf32>
    %c0_60 = arith.constant 0 : index
    %c0_61 = arith.constant 0 : index
    %c0_62 = arith.constant 0 : index
    %c0_63 = arith.constant 0 : index
    %60 = vector.load %arg5[%c0_60, %c0_61, %c0_62, %c0_63] : memref<1x1x80x48xf32, #tpu.memory_space<vmem>>, vector<1x1x80x48xf32>
    %61 = vector.shape_cast %60 : vector<1x1x80x48xf32> to vector<80x48xf32>
    %62 = vector.shape_cast %59 : vector<80x48xf32> to vector<1x1x80x48xf32>
    tpu.vector_store %arg5[%c0_60, %c0_61, %c0_62, %c0_63], %62 {strides = array<i32>} : memref<1x1x80x48xf32, #tpu.memory_space<vmem>>, vector<1x1x80x48xf32>,
    return
  }
  func.func @transform_0(%arg0: i32, %arg1: i32) -> (i32, i32, i32, i32) {
    %c0_i32 = arith.constant 0 : i32
    %c0_i32_0 = arith.constant 0 : i32
    %c0_i32_1 = arith.constant 0 : i32
    return %arg0, %arg1, %c0_i32, %c0_i32_0 : i32, i32, i32, i32
  }
  func.func @transform_1(%arg0: i32, %arg1: i32) -> (i32, i32, i32) {
    %c0_i32 = arith.constant 0 : i32
    %c0_i32_0 = arith.constant 0 : i32
    %c0_i32_1 = arith.constant 0 : i32
    %c0_i32_2 = arith.constant 0 : i32
    return %c0_i32, %c0_i32_0, %c0_i32_1 : i32, i32, i32
  }
  func.func @transform_2(%arg0: i32, %arg1: i32) -> (i32, i32) {
    %c0_i32 = arith.constant 0 : i32
    %c0_i32_0 = arith.constant 0 : i32
    %c0_i32_1 = arith.constant 0 : i32
    return %c0_i32, %c0_i32_0 : i32, i32
  }
  func.func @transform_3(%arg0: i32, %arg1: i32) -> (i32, i32, i32, i32) {
    %c0_i32 = arith.constant 0 : i32
    %c0_i32_0 = arith.constant 0 : i32
    %c0_i32_1 = arith.constant 0 : i32
    return %arg0, %arg1, %c0_i32, %c0_i32_0 : i32, i32, i32, i32
  }
}

</mosaic_0001>

<bundles_post_ra>
// kernel: tpu_custom_call.1
= control target key start
LH: loop header
LB: loop body
LE: loop exit
PB: predicated region body
PF: predicated region fallthrough
CT: control target
= control target key end

     0   :  { %8 = vsyncpa [#allocation3], 0  ;;  %s2584_s12 = smov 0   ;;  %s2586_s13 = smov 0   ;;  %s2869_s0 = inlined_call_operand.vmem [shape: f32[2,1,102,32], index: 0, kind: input, shape index: {}]   ;;  %s2870_s1 = inlined_call_operand.hbm [shape: f32[9,32,48], index: 1, kind: input, shape index: {}]   ;;  %s2871_s2 = inlined_call_operand.vmem [shape: f32[1,48], index: 2, kind: input, shape index: {}]   ;;  %s2872_s3 = inlined_call_operand.vmem [shape: f32[2,1,80,48], index: 3, kind: output, shape index: {}]  }
   0x1   :  { %s2588_s14 = smov 0  }
   0x2 LB: > { %s1875_s15 = sadd.s32 4294967295, %s2559_s14   ;;  %s26_s16 = sadd.s32 1, %s2555_s13  ;;  %s2559_s14 = sphi %s2588_s14, %s14_s14   ;;  %s2555_s13 = sphi %s2586_s13, %s2882_s13   ;;  %s2551_s12 = sphi %s2584_s12, %s2881_s12  }
   0x3   : > { %p28_p0 = scmp.ge.s32.totalorder %s26_s16, 2  ;;  %p1877_p1 = scmp.ge.s32.totalorder %s2559_s14, 1 }
   0x4   : > { %p129_p2 = scmp.lt.s32.totalorder %s2559_s14, 3  ;;  %p2609_p4 = scmp.eq.s32.totalorder %s1875_s15, 0 }
   0x5   : > { %s2884_s16 = smov (%p28_p0, %s26_s16), 0  ;;  %s2561_s19 = smov [#allocation2]  }
   0x6   : > { %p2605_p3 = pnand %p1877_p1, %p129_p2  ;;  %s141_s20 = sshll.u32 %s2561_s19, 4  ;;  %s142_s20 = int_to_ptr.vmem [resolvable:$true] %s141_s20 }
   0x7   : > { %s2877_s18 = scalar_select %p2609_p4, 1, 0 }
   0x8   : > { %s2876_s17 = scalar_select %p2605_p3, 1, 0 }
   0x9   : > { %p2472_p5 = pneg %p2605_p3  ;;  %s2505_s24 = scalar_lea.hbm %s2870_s1, 4608 }
   0xa   : > { %p2506_p7 = scmp.ne.s32.totalorder %s2870_s1, %s2505_s24  ;;  %p2512_p11 = scmp.lt.u32.totalorder %s2505_s24, %s2870_s1 }
   0xb   : > { %p2617_p6 = pnand %p2609_p4, %p2472_p5 }
   0xd   : > { %p2507_p8 = pneg %p2617_p6 }
   0xf   : > { %p2508_p9 = pnand %p2507_p8, %p2506_p7 }
  0x11   : > { %p2509_p10 = pneg %p2508_p9 }
  0x13   : > { %p2514_p12 = pnand %p2512_p11, %p2509_p10 }
  0x15   : > { %2517 = shalt.err (!%p2514_p12)
}
  0x16   : > { %s2518_s29 = scalar_lea.vmem %s142_s20, 4608  ;;  %p2526_p2 = scmp.lt.s32.totalorder %s142_s20, %s142_s20 }
  0x17   : > { %p2519_p13 = scmp.ne.s32.totalorder %s142_s20, %s2518_s29  ;;  %p2527_p5 = scmp.lt.s32.totalorder %s2518_s29, %s2518_s29 }
  0x19   : > { %p2521_p0 = pnand %p2519_p13, %p2507_p8  ;;  %p2528_p4 = por %p2527_p5, %p2526_p2 }
  0x1b   : > { %p2522_p1 = pneg %p2521_p0 }
  0x1d   : > { %p2529_p3 = pnand %p2528_p4, %p2522_p1 }
  0x1f   : > { %2532 = shalt.err (!%p2529_p3)
}
  0x20   : > { %s2562_s30 = smov 128   ;;  %s2563_s4 = smov 8  }
  0x21   : > { %2475 = dma.hbm_to_vmem [thread:$0]  (!%p2617_p6), %s2870_s1, 4608, %s142_s20, [#allocation3], %s2562_s30, %s2562_s30, %s2563_s4  }
  0x22   : > { %p2879_p7 = scmp.ne.s32.totalorder %s2876_s17, 0 }
  0x23   : > { %p2880_p9 = scmp.ne.s32.totalorder (!%p2879_p7), %s2877_s18, 0 }
  0x24   : > { %172 = sbr.rel (%p2879_p7) target bundleno = 363 (0x16b), region = 32 }
  0x2b   : > { %2546 = dma.done.wait (%p2880_p9), [#allocation3], 4608  }
  0x2c   : > { %2548 = vsyncadd (%p2880_p9), [#allocation3], 4294962688  ;;  %p204_p3 = scmp.lt.s32.totalorder %s2551_s12, 1  ;;  %v247_v0 = vld [vmem:[#allocation2 + $0x20] sm:$0xff]  ;;  %v248_v1 = vld [vmem:[#allocation2 + $0x28] sm:$0xff]  ;;  %vm251_vm0 = vcmask 261120  }
  0x2d   : > { %v893_v2 = vld [vmem:[#allocation2 + $0x80] sm:$0xff]  ;;  %v2310_v3 = vpack.c.bf16 %v248_v1, %v247_v0  ;;  %v894_v4 = vld [vmem:[#allocation2 + $0x88] sm:$0xff]  ;;  %v249_v5 = vld [vmem:[#allocation2 + $0x30] sm:$0xff]  ;;  %vm1759_vm1 = vcmask 392192  }
  0x2e   : > { %s2886_s12 = smov (!%p204_p3, %s2551_s12), 1  ;;  %v250_v6 = vld [vmem:[#allocation2 + $0x38] sm:$0xff]  ;;  %v2653_v7 = vpack.c.bf16 %v894_v4, %v893_v2  ;;  %v895_v9 = vld [vmem:[#allocation2 + $0x90] sm:$0xff]  ;;  %v232_v14 = vld [vmem:[#allocation2] sm:$0xff] }
  0x2f   : > { %s2466_s7 = smul.u32 104, %s2886_s12  ;;  %v2314_v8 = vpack.c.bf16 %v250_v6, %v249_v5  ;;  %v896_v10 = vld [vmem:[#allocation2 + $0x98] sm:$0xff]  ;;  %2311 = vmatprep.subr.bf16.mxu1 %v2310_v3  ;;  %v233_v15 = vld [vmem:[#allocation2 + $0x8] sm:$0xff]  ;;  %v1063_v16 = vld [vmem:[#allocation2 + $0xa0] sm:$0xff] }
  0x30   : > { %v2656_v12 = vpack.c.bf16 %v896_v10, %v895_v9  ;;  %2343 = vmatprep.subr.bf16.mxu0 %v2653_v7  ;;  %2313 = vmatpush3.bf16.msra.mxu1 %v2310_v3  ;;  %v2318_v17 = vpack.c.bf16 %v233_v15, %v232_v14  ;;  %v1064_v18 = vld [vmem:[#allocation2 + $0xa8] sm:$0xff]  ;;  %v1065_v20 = vld [vmem:[#allocation2 + $0xb0] sm:$0xff]  ;;  %v1066_v21 = vld [vmem:[#allocation2 + $0xb8] sm:$0xff]  ;;  %s2467_s11 = smul.u32 80, %s2886_s12 }
  0x31   : > { %s2651_s10 = scalar_lea.vmem %s2869_s0, %s2466_s7  ;;  %2345 = vmatpush3.bf16.msra.mxu0 %v2653_v7  ;;  %2315 = vmatprep.subr.bf16.mxu1 %v2314_v8  ;;  %v2350_v19 = vpack.c.bf16 %v1064_v18, %v1063_v16  ;;  %v234_v23 = vld [vmem:[#allocation2 + $0x10] sm:$0xff]  ;;  %v235_v25 = vld [vmem:[#allocation2 + $0x18] sm:$0xff]  ;;  %v2354_v27 = vpack.c.bf16 %v1066_v21, %v1065_v20  ;;  %v1233_v30 = vld [vmem:[#allocation2 + $0xc0] sm:$0xff] }
  0x32   : > { %v236_v11 = vld [vmem:[%s2651_s10 + $0x1] sm:$0xff]  ;;  %v882_v13 = vld [vmem:[%s2651_s10 + $0xb] sm:$0xff]  ;;  %2347 = vmatprep.subr.bf16.mxu0 %v2656_v12  ;;  %v883_v24 = vld [vmem:[%s2651_s10 + $0x13] sm:$0xff]  ;;  %v2322_v29 = vpack.c.bf16 %v235_v25, %v234_v23  ;;  %s2838_s20 = scalar_lea.vmem %s2872_s3, %s2467_s11 }
  0x33   : > { %2111 = vmatprep.mubr.msk.f32.mxu1 %vm251_vm0, %v236_v11  ;;  %2203 = vmatprep.mubr.msk.f32.mxu0 %vm251_vm0, %v882_v13  ;;  %v237_v22 = vld [vmem:[%s2651_s10 + $0x9] sm:$0xff]  ;;  %v238_v26 = vld [vmem:[%s2651_s10 + $0x11] sm:$0xff]  ;;  %v884_v28 = vld [vmem:[%s2651_s10 + $0x1b] sm:$0xff] }
  0x34   : > { %2317 = vmatpush3.bf16.msra.mxu1 %v2314_v8  ;;  %v1234_v31 = vld [vmem:[#allocation2 + $0xc8] sm:$0xff]  ;;  %v239_v32 = vld [vmem:[%s2651_s10 + $0x19] sm:$0xff]  ;;  %v1235_v40 = vld [vmem:[#allocation2 + $0xd0] sm:$0xff] }
  0x35   : > { %2349 = vmatpush3.bf16.msra.mxu0 %v2656_v12  ;;  %2319 = vmatprep.subr.bf16.mxu1 %v2318_v17  ;;  %v885_v33 = vld [vmem:[%s2651_s10 + $0x23] sm:$0xff]  ;;  %v1052_v36 = vld [vmem:[%s2651_s10 + $0xc] sm:$0xff]  ;;  %v2358_v37 = vpack.c.bf16 %v1234_v31, %v1233_v30  ;;  %v1236_v41 = vld [vmem:[#allocation2 + $0xd8] sm:$0xff] }
  0x36   : > { %2351 = vmatprep.subr.bf16.mxu0 %v2350_v19  ;;  %v240_v34 = vld [vmem:[%s2651_s10 + $0x21] sm:$0xff]  ;;  %v241_v42 = vld [vmem:[%s2651_s10 + $0x29] sm:$0xff]  ;;  %v1053_v43 = vld [vmem:[%s2651_s10 + $0x14] sm:$0xff]  ;;  %v2362_v46 = vpack.c.bf16 %v1236_v41, %v1235_v40 }
  0x37   : > { %2112 = vmatmul.mubr.msk.f32.vlgmr.msra.gmra.mrb[0].mxu1 %vm251_vm0, %v237_v22  ;;  %v553_v35 = vld [vmem:[#allocation2 + $0x40] sm:$0xff]  ;;  %v554_v38 = vld [vmem:[#allocation2 + $0x48] sm:$0xff]  ;;  %v242_v44 = vld [vmem:[%s2651_s10 + $0x31] sm:$0xff] }
  0x38   : > { %2204 = vmatmul.mubr.msk.f32.vlgmr.msra.gmra.mrb[0].mxu0 %vm251_vm0, %v883_v24  ;;  %2321 = vmatpush3.bf16.msra.mxu1 %v2318_v17  ;;  %v2326_v39 = vpack.c.bf16 %v554_v38, %v553_v35  ;;  %v2685_v45 = vld [vmem:[%s2651_s10 + $0x1c] sm:$0xff]  ;;  %v1404_v48 = vld [vmem:[#allocation2 + $0xe8] sm:$0xff]  ;;  %v1057_v55 = vld [vmem:[%s2651_s10 + $0x34] sm:$0xff] }
  0x39   : > { %2353 = vmatpush3.bf16.msra.mxu0 %v2350_v19  ;;  %2114 = vmatprep.mubr.msk.f32.mxu1 %vm251_vm0, %v238_v26  ;;  %v1403_v47 = vld [vmem:[#allocation2 + $0xe0] sm:$0xff]  ;;  %v1056_v52 = vld [vmem:[%s2651_s10 + $0x2c] sm:$0xff]  ;;  %v556_v59 = vld [vmem:[#allocation2 + $0x58] sm:$0xff] }
  0x3a   : > { %2206 = vmatprep.mubr.msk.f32.mxu0 %vm251_vm0, %v884_v28  ;;  %2355 = vmatprep.subr.bf16.mxu0 %v2354_v27  ;;  %v243_v49 = vld [vmem:[%s2651_s10 + $0x39] sm:$0xff]  ;;  %v1055_v50 = vld [vmem:[%s2651_s10 + $0x24] sm:$0xff]  ;;  %v2366_v53 = vpack.c.bf16 %v1404_v48, %v1403_v47  ;;  %v555_v58 = vld [vmem:[#allocation2 + $0x50] sm:$0xff] }
  0x3b   : > { %2115 = vmatmul.mubr.msk.f32.gmra.mrb[2].mxu1 %vm251_vm0, %v239_v32  ;;  %2323 = vmatprep.subr.bf16.mxu1 %v2322_v29  ;;  %v244_v51 = vld [vmem:[%s2651_s10 + $0x41] sm:$0xff]  ;;  %v245_v54 = vld [vmem:[%s2651_s10 + $0x49] sm:$0xff]  ;;  %v2330_v0 = vpack.c.bf16 %v556_v59, %v555_v58  ;;  %v225_v3 = vld [vmem:[%s2651_s10 + $0x18] sm:$0xff] }
  0x3c   : > { %2207 = vmatmul.mubr.msk.f32.gmra.mrb[2].mxu0 %vm251_vm0, %v885_v33  ;;  %2117 = vmatprep.mubr.msk.f32.mxu1 %vm251_vm0, %v240_v34  ;;  %v222_v56 = vld [vmem:[%s2651_s10] sm:$0xff]  ;;  %v223_v60 = vld [vmem:[%s2651_s10 + $0x8] sm:$0xff]  ;;  %v224_v62 = vld [vmem:[%s2651_s10 + $0x10] sm:$0xff] }
  0x3d   : > { %2357 = vmatpush3.bf16.msra.mxu0 %v2354_v27  ;;  %2226 = vmatprep.mubr.msk.f32.mxu0 %vm251_vm0, %v1052_v36  ;;  %v1058_v57 = vld [vmem:[%s2651_s10 + $0x3c] sm:$0xff]  ;;  %v1059_v61 = vld [vmem:[%s2651_s10 + $0x44] sm:$0xff]  ;;  %v1060_v63 = vld [vmem:[%s2651_s10 + $0x4c] sm:$0xff] }
  0x3e   : > { %2325 = vmatpush3.bf16.msra.mxu1 %v2322_v29  ;;  %2359 = vmatprep.subr.bf16.mxu0 %v2358_v37  ;;  %v723_v1 = vld [vmem:[#allocation2 + $0x60] sm:$0xff]  ;;  %v724_v2 = vld [vmem:[#allocation2 + $0x68] sm:$0xff]  ;;  %v1061_v4 = vld [vmem:[%s2651_s10 + $0x54] sm:$0xff] }
  0x3f   : > { %2118 = vmatmul.mubr.msk.f32.gmra.mrb[4].mxu1 %vm251_vm0, %v241_v42  ;;  %2327 = vmatprep.subr.bf16.mxu1 %v2326_v39  ;;  %v226_v5 = vld [vmem:[%s2651_s10 + $0x20] sm:$0xff]  ;;  %v2334_v6 = vpack.c.bf16 %v724_v2, %v723_v1  ;;  %v1405_v8 = vld [vmem:[#allocation2 + $0xf0] sm:$0xff]  ;;  %v1406_v9 = vld [vmem:[#allocation2 + $0xf8] sm:$0xff] }
  0x40   : > { %2227 = vmatmul.mubr.msk.f32.vlgmr.msra.gmra.mrb[0].mxu0 %vm251_vm0, %v1053_v43  ;;  %2120 = vmatprep.mubr.msk.f32.mxu1 %vm251_vm0, %v242_v44  ;;  %v227_v10 = vld [vmem:[%s2651_s10 + $0x28] sm:$0xff]  ;;  %v228_v11 = vld [vmem:[%s2651_s10 + $0x30] sm:$0xff]  ;;  %v2370_v13 = vpack.c.bf16 %v1406_v9, %v1405_v8  ;;  %v1573_v14 = vld [vmem:[#allocation2 + $0x100] sm:$0xff] }
  0x41   : > { %2229 = vmatprep.mubr.msk.f32.mxu0 %vm251_vm0, %v2685_v45  ;;  %2361 = vmatpush3.bf16.msra.mxu0 %v2358_v37  ;;  %v1574_v15 = vld [vmem:[#allocation2 + $0x108] sm:$0xff]  ;;  %v229_v16 = vld [vmem:[%s2651_s10 + $0x38] sm:$0xff]  ;;  %v230_v17 = vld [vmem:[%s2651_s10 + $0x40] sm:$0xff] }
  0x42   : > { %2363 = vmatprep.subr.bf16.mxu0 %v2362_v46  ;;  %v2374_v18 = vpack.c.bf16 %v1574_v15, %v1573_v14  ;;  %v231_v19 = vld [vmem:[%s2651_s10 + $0x48] sm:$0xff]  ;;  %v725_v21 = vld [vmem:[#allocation2 + $0x70] sm:$0xff]  ;;  %v726_v22 = vld [vmem:[#allocation2 + $0x78] sm:$0xff] }
  0x43   : > { %2121 = vmatmul.mubr.msk.f32.gmra.mrb[6].mxu1 %vm251_vm0, %v243_v49  ;;  %v542_v20 = vld [vmem:[%s2651_s10 + $0x2] sm:$0xff]  ;;  %v543_v23 = vld [vmem:[%s2651_s10 + $0xa] sm:$0xff]  ;;  %v544_v24 = vld [vmem:[%s2651_s10 + $0x12] sm:$0xff]  ;;  %v2338_v25 = vpack.c.bf16 %v726_v22, %v725_v21 }
  0x44   : > { %2230 = vmatmul.mubr.msk.f32.gmra.mrb[2].mxu0 %vm251_vm0, %v1055_v50  ;;  %2123 = vmatprep.mubr.msk.f32.mxu1 %vm251_vm0, %v244_v51  ;;  %v545_v26 = vld [vmem:[%s2651_s10 + $0x1a] sm:$0xff]  ;;  %v546_v28 = vld [vmem:[%s2651_s10 + $0x22] sm:$0xff]  ;;  %v1575_v30 = vld [vmem:[#allocation2 + $0x110] sm:$0xff] }
  0x45   : > { %2232 = vmatprep.mubr.msk.f32.mxu0 %vm251_vm0, %v1056_v52  ;;  %2365 = vmatpush3.bf16.msra.mxu0 %v2362_v46  ;;  %v1231_v27 = vld [vmem:[%s2651_s10 + $0x5c] sm:$0xff]  ;;  %v547_v32 = vld [vmem:[%s2651_s10 + $0x2a] sm:$0xff]  ;;  %v548_v34 = vld [vmem:[%s2651_s10 + $0x32] sm:$0xff] }
  0x46   : > { %2367 = vmatprep.subr.bf16.mxu0 %v2366_v53  ;;  %v1392_v29 = vld [vmem:[%s2651_s10 + $0x15] sm:$0xff]  ;;  %v1393_v33 = vld [vmem:[%s2651_s10 + $0x1d] sm:$0xff]  ;;  %v1394_v35 = vld [vmem:[%s2651_s10 + $0x25] sm:$0xff] }
  0x47   : > { %2124 = vmatmul.mubr.msk.f32.gmra.mrb[8].mxu1 %vm251_vm0, %v245_v54  ;;  %v1576_v31 = vld [vmem:[#allocation2 + $0x118] sm:$0xff]  ;;  %v1395_v38 = vld [vmem:[%s2651_s10 + $0x2d] sm:$0xff]  ;;  %v889_v58 = vld [vmem:[%s2651_s10 + $0x43] sm:$0xff] }
  0x48   : > { %2233 = vmatmul.mubr.msk.f32.gmra.mrb[4].mxu0 %vm251_vm0, %v1057_v55  ;;  %2134 = vmatprep.mubr.msk.f32.mxu1 %vm251_vm0, %v222_v56  ;;  %v2378_v36 = vpack.c.bf16 %v1576_v31, %v1575_v30  ;;  %v549_v37 = vld [vmem:[%s2651_s10 + $0x3a] sm:$0xff]  ;;  %v551_v41 = vld [vmem:[%s2651_s10 + $0x4a] sm:$0xff] }
  0x49   : > { %2235 = vmatprep.mubr.msk.f32.mxu0 %vm251_vm0, %v1058_v57  ;;  %v1396_v40 = vld [vmem:[%s2651_s10 + $0x35] sm:$0xff]  ;;  %v1397_v42 = vld [vmem:[%s2651_s10 + $0x3d] sm:$0xff]  ;;  %v1399_v44 = vld [vmem:[%s2651_s10 + $0x4d] sm:$0xff] }
  0x4a   : > { %v1401_v46 = vld [vmem:[%s2651_s10 + $0x5d] sm:$0xff]  ;;  %v1564_v48 = vld [vmem:[%s2651_s10 + $0x26] sm:$0xff]  ;;  %v1565_v49 = vld [vmem:[%s2651_s10 + $0x2e] sm:$0xff] }
  0x4b   : > { %2135 = vmatmul.mubr.msk.f32.vlgmr.msra.gmra.mrb[0].mxu1 %vm251_vm0, %v223_v60  ;;  %v1562_v47 = vld [vmem:[%s2651_s10 + $0x16] sm:$0xff]  ;;  %v1567_v51 = vld [vmem:[%s2651_s10 + $0x3e] sm:$0xff]  ;;  %v890_v60 = vld [vmem:[%s2651_s10 + $0x4b] sm:$0xff] }
  0x4c   : > { %2236 = vmatmul.mubr.msk.f32.gmra.mrb[6].mxu0 %vm251_vm0, %v1059_v61  ;;  %2329 = vmatpush3.bf16.msra.mxu1 %v2326_v39  ;;  %v550_v39 = vld [vmem:[%s2651_s10 + $0x42] sm:$0xff]  ;;  %v887_v54 = vld [vmem:[%s2651_s10 + $0x33] sm:$0xff] }
  0x4d   : > { %2137 = vmatprep.mubr.msk.f32.mxu1 %vm251_vm0, %v224_v62  ;;  %2238 = vmatprep.mubr.msk.f32.mxu0 %vm251_vm0, %v1060_v63  ;;  %v888_v56 = vld [vmem:[%s2651_s10 + $0x3b] sm:$0xff] }
  0x4e   : > { %2331 = vmatprep.subr.bf16.mxu1 %v2330_v0  ;;  %v1571_v59 = vld [vmem:[%s2651_s10 + $0x5e] sm:$0xff] }
  0x4f   : > { %2138 = vmatmul.mubr.msk.f32.gmra.mrb[2].mxu1 %vm251_vm0, %v225_v3  ;;  %v1974_v3 = vld [vmem:[%s2871_s2] ss:$0 sm:$0xff] }
  0x50   : > { %2239 = vmatmul.mubr.msk.f32.gmra.mrb[8].mxu0 %vm251_vm0, %v1061_v4  ;;  %2140 = vmatprep.mubr.msk.f32.mxu1 %vm251_vm0, %v226_v5 }
  0x51   : > { %2249 = vmatprep.mubr.msk.f32.mxu0 %vm251_vm0, %v1053_v43  ;;  %2333 = vmatpush3.bf16.msra.mxu1 %v2330_v0  ;;  %v1398_v43 = vld [vmem:[%s2651_s10 + $0x45] sm:$0xff] }
  0x52   : > { %2335 = vmatprep.subr.bf16.mxu1 %v2334_v6 }
  0x53   : > { %2141 = vmatmul.mubr.msk.f32.gmra.mrb[4].mxu1 %vm251_vm0, %v227_v10 }
  0x54   : > { %2250 = vmatmul.mubr.msk.f32.vlgmr.msra.gmra.mrb[0].mxu0 %vm251_vm0, %v2685_v45  ;;  %2143 = vmatprep.mubr.msk.f32.mxu1 %vm251_vm0, %v228_v11  ;;  %v1400_v45 = vld [vmem:[%s2651_s10 + $0x55] sm:$0xff] }
  0x55   : > { %2252 = vmatprep.mubr.msk.f32.mxu0 %vm251_vm0, %v1055_v50  ;;  %2369 = vmatpush3.bf16.msra.mxu0 %v2366_v53  ;;  %v1566_v50 = vld [vmem:[%s2651_s10 + $0x36] sm:$0xff]  ;;  %v1568_v53 = vld [vmem:[%s2651_s10 + $0x46] sm:$0xff] }
  0x56   : > { %2371 = vmatprep.subr.bf16.mxu0 %v2370_v13 }
  0x57   : > { %2144 = vmatmul.mubr.msk.f32.gmra.mrb[6].mxu1 %vm251_vm0, %v229_v16 }
  0x58   : > { %2253 = vmatmul.mubr.msk.f32.gmra.mrb[2].mxu0 %vm251_vm0, %v1056_v52  ;;  %2146 = vmatprep.mubr.msk.f32.mxu1 %vm251_vm0, %v230_v17  ;;  %v886_v52 = vld [vmem:[%s2651_s10 + $0x2b] sm:$0xff] }
  0x59   : > { %2255 = vmatprep.mubr.msk.f32.mxu0 %vm251_vm0, %v1057_v55  ;;  %2373 = vmatpush3.bf16.msra.mxu0 %v2370_v13  ;;  %v1569_v55 = vld [vmem:[%s2651_s10 + $0x4e] sm:$0xff] }
  0x5a   : > { %2375 = vmatprep.subr.bf16.mxu0 %v2374_v18 }
  0x5b   : > { %2147 = vmatmul.mubr.msk.f32.gmra.mrb[8].mxu1 %vm251_vm0, %v231_v19 }
  0x5c   : > { %2256 = vmatmul.mubr.msk.f32.gmra.mrb[4].mxu0 %vm251_vm0, %v1058_v57  ;;  %2157 = vmatprep.mubr.msk.f32.mxu1 %vm251_vm0, %v542_v20  ;;  %v1570_v57 = vld [vmem:[%s2651_s10 + $0x56] sm:$0xff] }
  0x5d   : > { %2258 = vmatprep.mubr.msk.f32.mxu0 %vm251_vm0, %v1059_v61  ;;  %v891_v61 = vld [vmem:[%s2651_s10 + $0x53] sm:$0xff] }
  0x5f   : > { %2158 = vmatmul.mubr.msk.f32.vlgmr.msra.gmra.mrb[0].mxu1 %vm251_vm0, %v543_v23 }
  0x60   : > { %2259 = vmatmul.mubr.msk.f32.gmra.mrb[6].mxu0 %vm251_vm0, %v1060_v63  ;;  %2337 = vmatpush3.bf16.msra.mxu1 %v2334_v6 }
  0x61   : > { %2160 = vmatprep.mubr.msk.f32.mxu1 %vm251_vm0, %v544_v24  ;;  %2261 = vmatprep.mubr.msk.f32.mxu0 %vm251_vm0, %v1061_v4 }
  0x62   : > { %2339 = vmatprep.subr.bf16.mxu1 %v2338_v25 }
  0x63   : > { %2161 = vmatmul.mubr.msk.f32.gmra.mrb[2].mxu1 %vm251_vm0, %v545_v26 }
  0x64   : > { %2262 = vmatmul.mubr.msk.f32.gmra.mrb[8].mxu0 %vm251_vm0, %v1231_v27  ;;  %2163 = vmatprep.mubr.msk.f32.mxu1 %vm251_vm0, %v546_v28 }
  0x65   : > { %2272 = vmatprep.mubr.msk.f32.mxu0 %vm251_vm0, %v1392_v29  ;;  %2341 = vmatpush3.bf16.msra.mxu1 %v2338_v25 }
  0x66   : > { %2382 = vmatprep.subr.bf16.mxu1 %v2653_v7 }
  0x67   : > { %2164 = vmatmul.mubr.msk.f32.gmra.mrb[4].mxu1 %vm251_vm0, %v547_v32 }
  0x68   : > { %2273 = vmatmul.mubr.msk.f32.vlgmr.msra.gmra.mrb[0].mxu0 %vm251_vm0, %v1393_v33  ;;  %2166 = vmatprep.mubr.msk.f32.mxu1 %vm251_vm0, %v548_v34 }
  0x69   : > { %2275 = vmatprep.mubr.msk.f32.mxu0 %vm251_vm0, %v1394_v35  ;;  %2377 = vmatpush3.bf16.msra.mxu0 %v2374_v18 }
  0x6a   : > { %2379 = vmatprep.subr.bf16.mxu0 %v2378_v36 }
  0x6b   : > { %2167 = vmatmul.mubr.msk.f32.gmra.mrb[6].mxu1 %vm251_vm0, %v549_v37 }
  0x6c   : > { %2276 = vmatmul.mubr.msk.f32.gmra.mrb[2].mxu0 %vm251_vm0, %v1395_v38  ;;  %2169 = vmatprep.mubr.msk.f32.mxu1 %vm251_vm0, %v550_v39 }
  0x6d   : > { %2278 = vmatprep.mubr.msk.f32.mxu0 %vm251_vm0, %v1396_v40  ;;  %2381 = vmatpush3.bf16.msra.mxu0 %v2378_v36 }
  0x6f   : > { %2170 = vmatmul.mubr.msk.f32.gmra.mrb[8].mxu1 %vm251_vm0, %v551_v41 }
  0x70   : > { %2279 = vmatmul.mubr.msk.f32.gmra.mrb[4].mxu0 %vm251_vm0, %v1397_v42  ;;  %2180 = vmatprep.mubr.msk.f32.mxu1 %vm251_vm0, %v543_v23 }
  0x71   : > { %2281 = vmatprep.mubr.msk.f32.mxu0 %vm251_vm0, %v1398_v43 }
  0x73   : > { %2181 = vmatmul.mubr.msk.f32.vlgmr.msra.gmra.mrb[0].mxu1 %vm251_vm0, %v544_v24 }
  0x74   : > { %2282 = vmatmul.mubr.msk.f32.gmra.mrb[6].mxu0 %vm251_vm0, %v1399_v44  ;;  %2384 = vmatpush3.bf16.msra.mxu1 %v2653_v7  ;;  %v1563_v7 = vld [vmem:[%s2651_s10 + $0x1e] sm:$0xff] }
  0x75   : > { %2183 = vmatprep.mubr.msk.f32.mxu1 %vm251_vm0, %v545_v26  ;;  %2284 = vmatprep.mubr.msk.f32.mxu0 %vm251_vm0, %v1400_v45 }
  0x76   : > { %2383 = vmatprep.subr.bf16.mxu1 %v2656_v12 }
  0x77   : > { %2184 = vmatmul.mubr.msk.f32.gmra.mrb[2].mxu1 %vm251_vm0, %v546_v28 }
  0x78   : > { %2285 = vmatmul.mubr.msk.f32.gmra.mrb[8].mxu0 %vm251_vm0, %v1401_v46  ;;  %2186 = vmatprep.mubr.msk.f32.mxu1 %vm251_vm0, %v547_v32 }
  0x79   : > { %2295 = vmatprep.mubr.msk.f32.mxu0 %vm251_vm0, %v1562_v47  ;;  %2385 = vmatpush3.bf16.msra.mxu1 %v2656_v12  ;;  %v721_v12 = vld [vmem:[%s2651_s10 + $0x52] sm:$0xff] }
  0x7b   : > { %2187 = vmatmul.mubr.msk.f32.gmra.mrb[4].mxu1 %vm251_vm0, %v548_v34 }
  0x7c   : > { %2296 = vmatmul.mubr.msk.f32.vlgmr.msra.gmra.mrb[0].mxu0 %vm251_vm0, %v1563_v7  ;;  %2189 = vmatprep.mubr.msk.f32.mxu1 %vm251_vm0, %v549_v37 }
  0x7d   : > { %2298 = vmatprep.mubr.msk.f32.mxu0 %vm251_vm0, %v1564_v48 }
  0x7f   : > { %2190 = vmatmul.mubr.msk.f32.gmra.mrb[6].mxu1 %vm251_vm0, %v550_v39 }
  0x80   : > { %2299 = vmatmul.mubr.msk.f32.gmra.mrb[2].mxu0 %vm251_vm0, %v1565_v49  ;;  %2192 = vmatprep.mubr.msk.f32.mxu1 %vm251_vm0, %v551_v41 }
  0x81   : > { %2301 = vmatprep.mubr.msk.f32.mxu0 %vm251_vm0, %v1566_v50 }
  0x83   : > { %2193 = vmatmul.mubr.msk.f32.gmra.mrb[8].mxu1 %vm251_vm0, %v721_v12 }
  0x84   : > { %2302 = vmatmul.mubr.msk.f32.gmra.mrb[4].mxu0 %vm251_vm0, %v1567_v51  ;;  %2209 = vmatprep.mubr.msk.f32.mxu1 %vm251_vm0, %v886_v52 }
  0x85   : > { %2304 = vmatprep.mubr.msk.f32.mxu0 %vm251_vm0, %v1568_v53 }
  0x87   : > { %2210 = vmatmul.mubr.msk.f32.vlgmr.msra.gmra.mrb[4].mxu1 %vm251_vm0, %v887_v54 }
  0x88   : > { %2305 = vmatmul.mubr.msk.f32.gmra.mrb[6].mxu0 %vm251_vm0, %v1569_v55  ;;  %2212 = vmatprep.mubr.msk.f32.mxu1 %vm251_vm0, %v888_v56 }
  0x89   : > { %2307 = vmatprep.mubr.msk.f32.mxu0 %vm251_vm0, %v1570_v57 }
  0x8b   : > { %2213 = vmatmul.mubr.msk.f32.gmra.mrb[6].mxu1 %vm251_vm0, %v889_v58 }
  0x8c   : > { %2308 = vmatmul.mubr.msk.f32.gmra.mrb[8].mxu0 %vm251_vm0, %v1571_v59  ;;  %2215 = vmatprep.mubr.msk.f32.mxu1 %vm251_vm0, %v890_v60 }
  0x8f   : > { %2216 = vmatmul.mubr.msk.f32.gmra.mrb[8].mxu1 %vm251_vm0, %v891_v61 }
 0x146   : > { %v2182_v62 = vpop.f32.mrb[0].mxu1 }
 0x147   : > { %v823_v63 = vpop.f32.mrb[1].mxu1 }
 0x14a   : > { %v2185_v0 = vpop.f32.mrb[2].mxu1 }
 0x14b   : > { %v833_v1 = vpop.f32.mrb[3].mxu1 }
 0x14f   : > { %v2297_v2 = vpop.f32.mrb[0].mxu0 }
 0x150   : > { %v2386_v4 = vadd.f32 %v2297_v2, %v2182_v62  ;;  %v1673_v5 = vpop.f32.mrb[1].mxu0 }
 0x151   : > { %v2387_v6 = vadd.f32 %v1673_v5, %v823_v63 }
 0x152   : > { %v1740_v8 = vadd.f32 %v2386_v4, %v1974_v3 }
 0x153   : > { %v1739_v9 = vadd.f32 %v2387_v6, %v1974_v3  ;;  %v2300_v10 = vpop.f32.mrb[2].mxu0 }
 0x154   : > { %v1750_v11 = vmax.f32 %v1740_v8, 0.0  ;;  %v2388_v13 = vadd.f32 %v2300_v10, %v2185_v0  ;;  %v1683_v14 = vpop.f32.mrb[3].mxu0 }
 0x155   : > { %v1749_v15 = vmax.f32 %v1739_v9, 0.0  ;;  %v2389_v16 = vadd.f32 %v1683_v14, %v833_v1 }
 0x156   : > { %1761 = vst.msk [vmem:[%s2838_s20 + $0x8] sm:$0xff] %vm1759_vm1, %v1750_v11  ;;  %v1742_v17 = vadd.f32 %v2388_v13, %v1974_v3 }
 0x157   : > { %1760 = vst.msk [vmem:[%s2838_s20] sm:$0xff] %vm1759_vm1, %v1749_v15  ;;  %v1741_v18 = vadd.f32 %v2389_v16, %v1974_v3  ;;  %v2303_v19 = vpop.f32.mrb[4].mxu0 }
 0x158   : > { %v1752_v20 = vmax.f32 %v1742_v17, 0.0  ;;  %v1693_v21 = vpop.f32.mrb[5].mxu0 }
 0x159   : > { %v1751_v22 = vmax.f32 %v1741_v18, 0.0 }
 0x15a   : > { %1763 = vst.msk [vmem:[%s2838_s20 + $0x18] sm:$0xff] %vm1759_vm1, %v1752_v20  ;;  %v2211_v23 = vpop.f32.mrb[4].mxu1 }
 0x15b   : > { %1762 = vst.msk [vmem:[%s2838_s20 + $0x10] sm:$0xff] %vm1759_vm1, %v1751_v22  ;;  %v2390_v24 = vadd.f32 %v2303_v19, %v2211_v23  ;;  %v2306_v25 = vpop.f32.mrb[6].mxu0  ;;  %v1013_v26 = vpop.f32.mrb[5].mxu1 }
 0x15c   : > { %v2391_v27 = vadd.f32 %v1693_v21, %v1013_v26  ;;  %v1703_v28 = vpop.f32.mrb[7].mxu0 }
 0x15d   : > { %v1744_v29 = vadd.f32 %v2390_v24, %v1974_v3 }
 0x15e   : > { %v1743_v30 = vadd.f32 %v2391_v27, %v1974_v3  ;;  %v2214_v31 = vpop.f32.mrb[6].mxu1 }
 0x15f   : > { %v1754_v32 = vmax.f32 %v1744_v29, 0.0  ;;  %v2392_v33 = vadd.f32 %v2306_v25, %v2214_v31  ;;  %v2309_v34 = vpop.f32.mrb[8].mxu0  ;;  %v1023_v35 = vpop.f32.mrb[7].mxu1 }
 0x160   : > { %v1753_v36 = vmax.f32 %v1743_v30, 0.0  ;;  %v2393_v37 = vadd.f32 %v1703_v28, %v1023_v35  ;;  %v1713_v38 = vpop.f32.mrb[9].mxu0 }
 0x161   : > { %1765 = vst.msk [vmem:[%s2838_s20 + $0x28] sm:$0xff] %vm1759_vm1, %v1754_v32  ;;  %v1746_v39 = vadd.f32 %v2392_v33, %v1974_v3 }
 0x162   : > { %1764 = vst.msk [vmem:[%s2838_s20 + $0x20] sm:$0xff] %vm1759_vm1, %v1753_v36  ;;  %v1745_v40 = vadd.f32 %v2393_v37, %v1974_v3  ;;  %v2217_v41 = vpop.f32.mrb[8].mxu1 }
 0x163   : > { %v1756_v42 = vmax.f32 %v1746_v39, 0.0  ;;  %v2394_v43 = vadd.f32 %v2309_v34, %v2217_v41  ;;  %v1033_v44 = vpop.f32.mrb[9].mxu1 }
 0x164   : > { %v1755_v45 = vmax.f32 %v1745_v40, 0.0  ;;  %v2395_v46 = vadd.f32 %v1713_v38, %v1033_v44 }
 0x165   : > { %1767 = vst.msk [vmem:[%s2838_s20 + $0x38] sm:$0xff] %vm1759_vm1, %v1756_v42  ;;  %v1748_v47 = vadd.f32 %v2394_v43, %v1974_v3 }
 0x166   : > { %1766 = vst.msk [vmem:[%s2838_s20 + $0x30] sm:$0xff] %vm1759_vm1, %v1755_v45  ;;  %v1747_v7 = vadd.f32 %v2395_v46, %v1974_v3 }
 0x167   : > { %v1758_v48 = vmax.f32 %v1748_v47, 0.0 }
 0x168   : > { %v1757_v49 = vmax.f32 %v1747_v7, 0.0 }
 0x169   : > { %1769 = vst.msk [vmem:[%s2838_s20 + $0x48] sm:$0xff] %vm1759_vm1, %v1758_v48 }
 0x16a   : > { %1768 = vst.msk [vmem:[%s2838_s20 + $0x40] sm:$0xff] %vm1759_vm1, %v1757_v49 }
 0x16b PF: > { %s14_s14 = sadd.s32 1, %s2559_s14   ;;  %s2881_s12 = smov %s2555_s13 }
 0x16c   : > { %p11_p4 = scmp.ge.s32.totalorder %s14_s14, 4   ;;  %s2882_s13 = smov %s2884_s16 }
 0x16e   :  { %13 = sbr.rel (!%p11_p4) target bundleno = 2 (0x2), region = 75 }
 0x175   :  { %1799 = vsyncpa [#allocation3], 1 }
 0x176   :  { %1801 = vsyncpa [#allocation3 + $0x1], 1 }

</bundles_post_ra>
